<compile_context>
chip_gen: v6e
topology: v6e:2x2x1
jax: 0.10.0
libtpu: 0.0.40
codegen_flags: <defaults>
</compile_context>

<pallas_src>
import jax
import jax.numpy as jnp
from jax.experimental import pallas as pl
from jax.experimental.pallas import tpu as pltpu


def _scale_shift_kernel(x_ref, scale_ref, shift_ref, o_ref):
    # Pure VPU elementwise op: (TB, D_eff) * (1, D_eff) + (1, D_eff),
    # broadcast over sublanes. Compute in f32 regardless of I/O dtype.
    x = x_ref[...].astype(jnp.float32)
    s = scale_ref[...].astype(jnp.float32)
    t = shift_ref[...].astype(jnp.float32)
    o_ref[...] = (x * s + t).astype(o_ref.dtype)


def scale_shift(x, scaler, shifter):
    """x: (B, D); scaler/shifter: (1, D). Returns x * scaler + shifter."""
    B, D = x.shape
    assert scaler.shape == (1, D) and shifter.shape == (1, D)
    dtype = x.dtype
    itemsize = jnp.dtype(dtype).itemsize

    # ---- Lane-dense packing: make the last dim exactly 128 when cheap.
    if D < 128 and (128 % D == 0):
        pack = 128 // D
    else:
        pack = 1
    d_eff = D * pack

    pad_rows_pack = (-B) % pack
    if pad_rows_pack:
        # Only happens when B is not a multiple of pack (< pack extra rows).
        x = jnp.pad(x, ((0, pad_rows_pack), (0, 0)))
    b_packed = (B + pad_rows_pack) // pack
    x2 = x.reshape(b_packed, d_eff)
    if pack > 1:
        scale2 = jnp.tile(scaler, (1, pack))
        shift2 = jnp.tile(shifter, (1, pack))
    else:
        scale2, shift2 = scaler, shifter

    # ---- Row tile: target ~2 MiB per x block (multiple of 8 sublanes).
    target_rows = max(8, (2 << 20) // max(1, d_eff * itemsize))
    target_rows = max(8, (target_rows // 8) * 8)
    if b_packed < 8:
        # Block row dim equals the full array dim (allowed by the layout rule)
        # -> single grid step, no padding needed for tiny inputs.
        tb = b_packed
    else:
        tb = min(target_rows, (b_packed // 8) * 8)
    grid = (pl.cdiv(b_packed, tb),)

    out = pl.pallas_call(
        _scale_shift_kernel,
        out_shape=jax.ShapeDtypeStruct((b_packed, d_eff), dtype),
        grid_spec=pltpu.PrefetchScalarGridSpec(
            num_scalar_prefetch=0,
            grid=grid,
            in_specs=[
                # x: one (tb, d_eff) row-block per grid step (ragged last block
                # is masked by Pallas).
                pl.BlockSpec((tb, d_eff), lambda i: (i, 0)),
                # scaler / shifter: constant block index -> fetched once,
                # stays VMEM-resident across the whole grid.
                pl.BlockSpec((1, d_eff), lambda i: (0, 0)),
                pl.BlockSpec((1, d_eff), lambda i: (0, 0)),
            ],
            out_specs=pl.BlockSpec((tb, d_eff), lambda i: (i, 0)),
        ),
        compiler_params=pltpu.CompilerParams(
            # Row tiles are independent -> shard grid steps across TCs on v7x.
            dimension_semantics=("parallel",),
            vmem_limit_bytes=32 << 20,
        ),
    )(x2, scale2, shift2)

    # Undo lane packing and (rare) pack-alignment padding.
    out = out.reshape(b_packed * pack, D)[:B]
    return out


_scale_shift_jit = jax.jit(scale_shift)


class ScaleShiftPallas:
    """JAX/Pallas port of the PyTorch ScaleShift module (forward pass).

    Note: the const vs learnable distinction only affects trainability in
    PyTorch; forward semantics (x * scaler + shifter with a (1, D) or scalar
    scaler/shifter broadcast) are identical, so both cases are stored as
    (1, D) arrays here.
    """

    def __init__(self, input_dim, scaler_const=False, shifter_const=False,
                 scaler_init=1.0, shifter_init=0.0):
        self.input_dim = input_dim
        self.scaler = jnp.ones((1, input_dim), jnp.float32) * scaler_init
        self.shifter = jnp.ones((1, input_dim), jnp.float32) * shifter_init

    def __call__(self, x):
        # TODO(synk): for genuinely tiny inputs, fusing x*scaler+shifter into
        # the adjacent op via plain XLA beats any standalone kernel.
        return _scale_shift_jit(x, self.scaler, self.shifter)


if __name__ == "__main__":
    key = jax.random.PRNGKey(0)

    # Small demo shape consistent with the module: (batch, input_dim).
    B, D = 8, 32
    x = jax.random.normal(key, (B, D), dtype=jnp.float32)
    mod = ScaleShiftPallas(input_dim=D, scaler_init=1.5, shifter_init=-0.25)
    out = jax.block_until_ready(mod(x))
    ref = x * mod.scaler + mod.shifter
    assert out.shape == (B, D) and out.dtype == jnp.float32
    assert jnp.allclose(out, ref, rtol=1e-6, atol=1e-6)

    # Secondary check: multi-tile grid with a ragged (partial) last block.
    B2, D2 = 2051, 256
    key2 = jax.random.PRNGKey(0)
    x2 = jax.random.normal(key2, (B2, D2), dtype=jnp.float32)
    mod2 = ScaleShiftPallas(input_dim=D2, scaler_init=0.75, shifter_init=2.0)
    out2 = jax.block_until_ready(mod2(x2))
    ref2 = x2 * mod2.scaler + mod2.shifter
    assert out2.shape == (B2, D2)
    assert jnp.allclose(out2, ref2, rtol=1e-6, atol=1e-6)

    # Third check: bf16 I/O and a batch that is not a multiple of the pack.
    B3, D3 = 37, 64
    x3 = jax.random.normal(jax.random.PRNGKey(0), (B3, D3), dtype=jnp.bfloat16)
    mod3 = ScaleShiftPallas(input_dim=D3, scaler_init=-2.0, shifter_init=0.5)
    out3 = jax.block_until_ready(mod3(x3))
    ref3 = (x3.astype(jnp.float32) * mod3.scaler + mod3.shifter).astype(jnp.bfloat16)
    assert out3.shape == (B3, D3) and out3.dtype == jnp.bfloat16
    assert jnp.allclose(out3.astype(jnp.float32), ref3.astype(jnp.float32),
                        rtol=2e-2, atol=2e-2)

    print("KERNEL_OK")
</pallas_src>

<mosaic_0001>
module attributes {stable_mosaic.version = 11 : i64} {
  func.func @_scale_shift_kernel(%arg0: i32, %arg1: memref<2x128xf32, #tpu.memory_space<vmem>>, %arg2: memref<1x128xf32, #tpu.memory_space<vmem>>, %arg3: memref<1x128xf32, #tpu.memory_space<vmem>>, %arg4: memref<2x128xf32, #tpu.memory_space<vmem>>) attributes {dimension_semantics = [#tpu.dimension_semantics<parallel>], iteration_bounds = array<i64: 1>, scalar_prefetch = 0 : i64, scratch_operands = 0 : i64, tpu.core_type = #tpu.core_type<tc>, window_params = [{transform_indices = @transform_0, window_bounds = array<i64: 2, 128>}, {pipeline_mode = #tpu.pipeline_mode<synchronous>, transform_indices = @transform_1, window_bounds = array<i64: 1, 128>}, {pipeline_mode = #tpu.pipeline_mode<synchronous>, transform_indices = @transform_2, window_bounds = array<i64: 1, 128>}, {transform_indices = @transform_3, window_bounds = array<i64: 2, 128>}]} {
    %c0 = arith.constant 0 : index
    %c0_0 = arith.constant 0 : index
    %0 = vector.load %arg1[%c0, %c0_0] : memref<2x128xf32, #tpu.memory_space<vmem>>, vector<2x128xf32>
    %c0_1 = arith.constant 0 : index
    %c0_2 = arith.constant 0 : index
    %1 = vector.load %arg2[%c0_1, %c0_2] : memref<1x128xf32, #tpu.memory_space<vmem>>, vector<1x128xf32>
    %c0_3 = arith.constant 0 : index
    %c0_4 = arith.constant 0 : index
    %2 = vector.load %arg3[%c0_3, %c0_4] : memref<1x128xf32, #tpu.memory_space<vmem>>, vector<1x128xf32>
    %3 = vector.broadcast %1 : vector<1x128xf32> to vector<2x128xf32>
    %4 = arith.mulf %0, %3 : vector<2x128xf32>
    %5 = vector.broadcast %2 : vector<1x128xf32> to vector<2x128xf32>
    %6 = arith.addf %4, %5 : vector<2x128xf32>
    %c0_5 = arith.constant 0 : index
    %c0_6 = arith.constant 0 : index
    %7 = vector.load %arg4[%c0_5, %c0_6] : memref<2x128xf32, #tpu.memory_space<vmem>>, vector<2x128xf32>
    tpu.vector_store %arg4[%c0_5, %c0_6], %6 {strides = array<i32>} : memref<2x128xf32, #tpu.memory_space<vmem>>, vector<2x128xf32>,
    return
  }
  func.func @transform_0(%arg0: i32) -> (i32, i32) {
    %c0_i32 = arith.constant 0 : i32
    %c0_i32_0 = arith.constant 0 : i32
    return %arg0, %c0_i32 : i32, i32
  }
  func.func @transform_1(%arg0: i32) -> (i32, i32) {
    %c0_i32 = arith.constant 0 : i32
    %c0_i32_0 = arith.constant 0 : i32
    %c0_i32_1 = arith.constant 0 : i32
    return %c0_i32, %c0_i32_0 : i32, i32
  }
  func.func @transform_2(%arg0: i32) -> (i32, i32) {
    %c0_i32 = arith.constant 0 : i32
    %c0_i32_0 = arith.constant 0 : i32
    %c0_i32_1 = arith.constant 0 : i32
    return %c0_i32, %c0_i32_0 : i32, i32
  }
  func.func @transform_3(%arg0: i32) -> (i32, i32) {
    %c0_i32 = arith.constant 0 : i32
    %c0_i32_0 = arith.constant 0 : i32
    return %arg0, %c0_i32 : i32, i32
  }
}

</mosaic_0001>

<bundles_post_ra>
// kernel: scale_shift.1
= control target key start
LH: loop header
LB: loop body
LE: loop exit
PB: predicated region body
PF: predicated region fallthrough
CT: control target
= control target key end

     0   :  { %s70_s0 = inlined_call_operand.vmem [shape: f32[2,128], index: 0, kind: input, shape index: {}]   ;;  %s71_s1 = inlined_call_operand.vmem [shape: f32[1,128], index: 1, kind: input, shape index: {}]   ;;  %s72_s2 = inlined_call_operand.vmem [shape: f32[1,128], index: 2, kind: input, shape index: {}]   ;;  %s73_s3 = inlined_call_operand.vmem [shape: f32[2,128], index: 3, kind: output, shape index: {}]  }
   0x1   :  { %v14_v0 = vld [vmem:[%s70_s0] sm:$0x3] }
   0x2   :  { %v36_v1 = vld [vmem:[%s71_s1] ss:$0 sm:$0xff] }
   0x3   :  { %v37_v2 = vld [vmem:[%s72_s2] ss:$0 sm:$0xff]  ;;  %v23_v3 = vmul.f32 %v36_v1, %v14_v0 }
   0x5   :  { %v30_v4 = vadd.f32 %v37_v2, %v23_v3 }
   0x7   :  { %31 = vst [vmem:[%s73_s3] sm:$0x3] %v30_v4 }

</bundles_post_ra>
